<compile_context>
chip_gen: v6e
topology: v6e:2x2x1
jax: 0.10.0
libtpu: 0.0.40
codegen_flags: <defaults>
</compile_context>

<pallas_src>
import functools
import math

import numpy as np
import jax
import jax.numpy as jnp
from jax.experimental import pallas as pl
from jax.experimental.pallas import tpu as pltpu

EPS = 1e-5
_INV_SQRT2 = 1.0 / math.sqrt(2.0)


def _light_residual_kernel(x_ref, gamma_ref, beta_ref, w_ref, o_ref, ypad_ref,
                           *extra_scratch, img_w, left_pad, imgs_per_block, use_im2col):
    """One grid step: B_blk images packed on the sublane axis as (B_blk*C, H*W)."""
    R, HW = x_ref.shape          # R = B_blk * C rows, HW on lanes
    B = imgs_per_block
    C = R // B
    LP = left_pad
    W = img_w

    x = x_ref[...].astype(jnp.float32)                          # (R, HW)

    # ---- InstanceNorm2d: single-pass stats, affine folded into per-row scale/shift ----
    mean = jnp.mean(x, axis=-1, keepdims=True)                   # (R, 1)
    var = jnp.mean(x * x, axis=-1, keepdims=True) - mean * mean
    scale = jax.lax.rsqrt(var + EPS) * gamma_ref[...]            # (R, 1)
    shift = beta_ref[...] - mean * scale
    y = x * scale + shift

    # ---- GELU (exact erf: matches nn.GELU() default; tanh-approx would offload to EUP) ----
    y = 0.5 * y * (1.0 + jax.lax.erf(y * _INV_SQRT2))

    # ---- stage into a flat, zero-haloed buffer (halos re-zeroed each step: scratch is per-core) --
    ypad_ref[:, :LP] = jnp.zeros((R, LP), jnp.float32)
    ypad_ref[:, LP + HW:] = jnp.zeros((R, LP), jnp.float32)
    ypad_ref[:, LP:LP + HW] = y                                   # lane-aligned full-width store

    # ---- in-kernel column-edge masks (zero columns that wrap across the left/right image edge) --
    col = jax.lax.broadcasted_iota(jnp.int32, (1, HW), 1) % W
    mask_l = (col >= 1).astype(jnp.float32)
    mask_r = (col <= W - 2).astype(jnp.float32)

    mm_dtype = w_ref.dtype

    if use_im2col:
        # Small C: pack 9 lane-shifted taps into (9*C, B*HW) and do ONE K=9C matmul per step.
        im2col_ref = extra_scratch[0]
        for dy in range(3):
            for dx in range(3):
                t = dy * 3 + dx
                delta = (dy - 1) * W + (dx - 1)
                tap = ypad_ref[:, LP + delta:LP + delta + HW]     # (R, HW); row OOB -> halo zeros
                if dx == 0:
                    tap = tap * mask_l
                elif dx == 2:
                    tap = tap * mask_r
                tap = tap.astype(mm_dtype)
                for b in range(B):
                    im2col_ref[t * C:(t + 1) * C, b * HW:(b + 1) * HW] = tap[b * C:(b + 1) * C, :]
        conv = jnp.dot(w_ref[...], im2col_ref[...],
                       preferred_element_type=jnp.float32)        # (C, B*HW)
        for b in range(B):
            xb = x_ref[b * C:(b + 1) * C, :].astype(jnp.float32)  # re-read: keep live ranges short
            o_ref[b * C:(b + 1) * C, :] = (xb + conv[:, b * HW:(b + 1) * HW]).astype(o_ref.dtype)
    else:
        # Large C: skip im2col scratch; accumulate nine (C,C)x(C,HW) matmuls in f32.
        for b in range(B):
            acc = jnp.zeros((C, HW), jnp.float32)
            for dy in range(3):
                for dx in range(3):
                    t = dy * 3 + dx
                    delta = (dy - 1) * W + (dx - 1)
                    tap = ypad_ref[b * C:(b + 1) * C, LP + delta:LP + delta + HW]
                    if dx == 0:
                        tap = tap * mask_l
                    elif dx == 2:
                        tap = tap * mask_r
                    acc = acc + jnp.dot(w_ref[t], tap.astype(mm_dtype),
                                        preferred_element_type=jnp.float32)
            xb = x_ref[b * C:(b + 1) * C, :].astype(jnp.float32)
            o_ref[b * C:(b + 1) * C, :] = (xb + acc).astype(o_ref.dtype)


def _pick_block_batch(n, c, per_image_bytes, budget_bytes):
    """Images per grid step: grow toward the VMEM budget, keep B*C sublane-aligned (or full array),
    and prefer >=2 grid steps when the batch allows (so both v7x TensorCores get work)."""
    divisors = [d for d in range(1, n + 1) if n % d == 0]
    aligned = [d for d in divisors if (d * c) % 8 == 0 or d == n]
    if not aligned:
        aligned = [n]
    fitting = [d for d in aligned if d * per_image_bytes <= budget_bytes] or [min(aligned)]
    best = max(fitting)
    if best == n and n >= 2:
        alt = [d for d in fitting if n // d >= 2]
        if alt:
            best = max(alt)
    return best


def light_residual_block(x, gamma, beta, conv_weight, *, matmul_dtype=jnp.bfloat16):
    """x: (N, C, H, W); gamma, beta: (C,); conv_weight: (C, C, 3, 3) (OIHW, no bias)."""
    N, C, H, W = x.shape
    HW = H * W
    use_im2col = (9 * C) < 512                      # small C -> single wide K=9C contraction

    left_pad = ((W + 1 + 127) // 128) * 128         # >= W+1 and lane-aligned center store
    hwp = HW + 2 * left_pad

    # ---- per-generation VMEM budget ----
    try:
        vmem_cap = int(pltpu.get_tpu_info().vmem_capacity_bytes)
    except Exception:
        vmem_cap = 64 * 1024 * 1024                 # conservative (v7x per-core) fallback
    vmem_budget = int(0.75 * vmem_cap)              # leave headroom for Mosaic internal scratch

    x_item = jnp.dtype(x.dtype).itemsize
    mm_item = jnp.dtype(matmul_dtype).itemsize
    per_image = C * HW * x_item * 2 * 2             # in + out blocks, double-buffered
    per_image += C * hwp * 4                        # zero-haloed staging (f32)
    if use_im2col:
        per_image += 9 * C * HW * mm_item           # im2col scratch
    B_blk = _pick_block_batch(N, C, per_image, vmem_budget // 3)
    grid = (N // B_blk,)

    # Lane-dense, sublane-dense layout: (N*C, H*W) — pure layout plumbing in the wrapper.
    x2 = x.reshape(N * C, HW)
    gamma_t = jnp.tile(gamma.reshape(C, 1).astype(jnp.float32), (B_blk, 1))
    beta_t = jnp.tile(beta.reshape(C, 1).astype(jnp.float32), (B_blk, 1))

    if use_im2col:
        # (C_out, C_in, kh, kw) -> (C_out, 9*C_in), tap-major / channel-minor (matches im2col rows).
        w_op = jnp.transpose(conv_weight, (0, 2, 3, 1)).reshape(C, 9 * C).astype(matmul_dtype)
        w_spec = pl.BlockSpec((C, 9 * C), lambda n: (0, 0))
        scratch = [pltpu.VMEM((B_blk * C, hwp), jnp.float32),
                   pltpu.VMEM((9 * C, B_blk * HW), matmul_dtype)]
    else:
        # (C_out, C_in, kh, kw) -> (9, C_out, C_in): one resident (C, C) weight per tap.
        w_op = jnp.transpose(conv_weight, (2, 3, 0, 1)).reshape(9, C, C).astype(matmul_dtype)
        w_spec = pl.BlockSpec((9, C, C), lambda n: (0, 0, 0))
        scratch = [pltpu.VMEM((B_blk * C, hwp), jnp.float32)]

    # Explicit VMEM request: blocks + residents + scratch, with margin, capped per generation.
    est = 2 * (B_blk * C * HW) * x_item * 2
    est += 2 * int(np.prod(w_op.shape)) * mm_item
    est += 4 * (gamma_t.size + beta_t.size) * 4
    est += B_blk * C * hwp * 4
    if use_im2col:
        est += 9 * C * B_blk * HW * mm_item
    vmem_limit = min(vmem_budget, max(32 * 1024 * 1024, 2 * est + 8 * 1024 * 1024))

    kernel = functools.partial(_light_residual_kernel, img_w=W, left_pad=left_pad,
                               imgs_per_block=B_blk, use_im2col=use_im2col)

    out2 = pl.pallas_call(
        kernel,
        out_shape=jax.ShapeDtypeStruct((N * C, HW), x.dtype),
        grid_spec=pltpu.PrefetchScalarGridSpec(
            num_scalar_prefetch=0,
            grid=grid,
            in_specs=[
                pl.BlockSpec((B_blk * C, HW), lambda n: (n, 0)),   # x (lane+sublane dense)
                pl.BlockSpec((B_blk * C, 1), lambda n: (0, 0)),    # gamma (tiled, resident)
                pl.BlockSpec((B_blk * C, 1), lambda n: (0, 0)),    # beta (tiled, resident)
                w_spec,                                            # conv weight (resident)
            ],
            out_specs=pl.BlockSpec((B_blk * C, HW), lambda n: (n, 0)),
            scratch_shapes=scratch,
        ),
        compiler_params=pltpu.CompilerParams(
            dimension_semantics=("parallel",),
            vmem_limit_bytes=vmem_limit,
        ),
    )(x2, gamma_t, beta_t, w_op)
    return out2.reshape(N, C, H, W)


def _reference(x, gamma, beta, conv_weight):
    mean = jnp.mean(x, axis=(2, 3), keepdims=True)
    var = jnp.mean((x - mean) ** 2, axis=(2, 3), keepdims=True)
    y = (x - mean) / jnp.sqrt(var + EPS)
    y = y * gamma[None, :, None, None] + beta[None, :, None, None]
    y = jax.nn.gelu(y, approximate=False)
    conv = jax.lax.conv_general_dilated(
        y, conv_weight, window_strides=(1, 1), padding="SAME",
        dimension_numbers=("NCHW", "OIHW", "NCHW"))
    return x + conv


def _make_inputs(key, N, C, H, W):
    kx, kg, kb, kw = jax.random.split(key, 4)
    x = jax.random.normal(kx, (N, C, H, W), dtype=jnp.float32)
    gamma = 1.0 + 0.1 * jax.random.normal(kg, (C,), dtype=jnp.float32)
    beta = 0.1 * jax.random.normal(kb, (C,), dtype=jnp.float32)
    fan_in = C * 3 * 3
    bound = 1.0 / math.sqrt(fan_in)
    conv_weight = jax.random.uniform(kw, (C, C, 3, 3), dtype=jnp.float32,
                                     minval=-bound, maxval=bound)
    return x, gamma, beta, conv_weight


if __name__ == "__main__":
    key = jax.random.PRNGKey(0)
    k1, k2 = jax.random.split(key, 2)

    # --- case 1: small C (im2col / single K=9C contraction path) ---
    x, gamma, beta, w = _make_inputs(k1, 2, 4, 16, 16)
    ref = _reference(x, gamma, beta, w)

    out_f32 = jax.block_until_ready(light_residual_block(x, gamma, beta, w,
                                                         matmul_dtype=jnp.float32))
    np.testing.assert_allclose(np.asarray(out_f32), np.asarray(ref), rtol=1e-4, atol=1e-4)

    out_bf16 = jax.block_until_ready(light_residual_block(x, gamma, beta, w))  # bf16 MXU default
    np.testing.assert_allclose(np.asarray(out_bf16), np.asarray(ref), rtol=2e-2, atol=2e-2)

    # --- case 2: larger C (direct 9-tap accumulation path, no im2col scratch) ---
    x2, gamma2, beta2, w2 = _make_inputs(k2, 2, 64, 16, 16)
    ref2 = _reference(x2, gamma2, beta2, w2)
    out2 = jax.block_until_ready(light_residual_block(x2, gamma2, beta2, w2))
    np.testing.assert_allclose(np.asarray(out2), np.asarray(ref2), rtol=2e-2, atol=2e-2)

    print("KERNEL_OK")
</pallas_src>

<mosaic_0001>
module attributes {stable_mosaic.version = 11 : i64} {
  func.func @_light_residual_kernel(%arg0: i32, %arg1: memref<8x256xf32, #tpu.memory_space<vmem>>, %arg2: memref<8x1xf32, #tpu.memory_space<vmem>>, %arg3: memref<8x1xf32, #tpu.memory_space<vmem>>, %arg4: memref<4x36xf32, #tpu.memory_space<vmem>>, %arg5: memref<8x256xf32, #tpu.memory_space<vmem>>, %arg6: memref<8x512xf32, #tpu.memory_space<vmem>>, %arg7: memref<36x512xf32, #tpu.memory_space<vmem>>) attributes {dimension_semantics = [#tpu.dimension_semantics<parallel>], iteration_bounds = array<i64: 1>, scalar_prefetch = 0 : i64, scratch_operands = 2 : i64, tpu.core_type = #tpu.core_type<tc>, window_params = [{transform_indices = @transform_0, window_bounds = array<i64: 8, 256>}, {pipeline_mode = #tpu.pipeline_mode<synchronous>, transform_indices = @transform_1, window_bounds = array<i64: 8, 1>}, {pipeline_mode = #tpu.pipeline_mode<synchronous>, transform_indices = @transform_2, window_bounds = array<i64: 8, 1>}, {pipeline_mode = #tpu.pipeline_mode<synchronous>, transform_indices = @transform_3, window_bounds = array<i64: 4, 36>}, {transform_indices = @transform_4, window_bounds = array<i64: 8, 256>}]} {
    %c0 = arith.constant 0 : index
    %c0_0 = arith.constant 0 : index
    %0 = vector.load %arg1[%c0, %c0_0] : memref<8x256xf32, #tpu.memory_space<vmem>>, vector<8x256xf32>
    %cst = arith.constant dense<0.000000e+00> : vector<8xf32>
    %1 = vector.multi_reduction <add>, %0, %cst [1] : vector<8x256xf32> to vector<8xf32>
    %2 = vector.shape_cast %1 : vector<8xf32> to vector<8x1xf32>
    %cst_1 = arith.constant 2.560000e+02 : f32
    %3 = vector.broadcast %cst_1 : f32 to vector<8x1xf32>
    %4 = arith.divf %2, %3 : vector<8x1xf32>
    %5 = arith.mulf %0, %0 : vector<8x256xf32>
    %cst_2 = arith.constant dense<0.000000e+00> : vector<8xf32>
    %6 = vector.multi_reduction <add>, %5, %cst_2 [1] : vector<8x256xf32> to vector<8xf32>
    %7 = vector.shape_cast %6 : vector<8xf32> to vector<8x1xf32>
    %cst_3 = arith.constant 2.560000e+02 : f32
    %8 = vector.broadcast %cst_3 : f32 to vector<8x1xf32>
    %9 = arith.divf %7, %8 : vector<8x1xf32>
    %10 = arith.mulf %4, %4 : vector<8x1xf32>
    %11 = arith.subf %9, %10 : vector<8x1xf32>
    %cst_4 = arith.constant 9.99999974E-6 : f32
    %12 = vector.broadcast %cst_4 : f32 to vector<8x1xf32>
    %13 = arith.addf %11, %12 : vector<8x1xf32>
    %14 = math.rsqrt %13 : vector<8x1xf32>
    %c0_5 = arith.constant 0 : index
    %c0_6 = arith.constant 0 : index
    %15 = vector.load %arg2[%c0_5, %c0_6] : memref<8x1xf32, #tpu.memory_space<vmem>>, vector<8x1xf32>
    %16 = arith.mulf %14, %15 : vector<8x1xf32>
    %c0_7 = arith.constant 0 : index
    %c0_8 = arith.constant 0 : index
    %17 = vector.load %arg3[%c0_7, %c0_8] : memref<8x1xf32, #tpu.memory_space<vmem>>, vector<8x1xf32>
    %18 = arith.mulf %4, %16 : vector<8x1xf32>
    %19 = arith.subf %17, %18 : vector<8x1xf32>
    %20 = vector.broadcast %16 : vector<8x1xf32> to vector<8x256xf32>
    %21 = arith.mulf %0, %20 : vector<8x256xf32>
    %22 = vector.broadcast %19 : vector<8x1xf32> to vector<8x256xf32>
    %23 = arith.addf %21, %22 : vector<8x256xf32>
    %cst_9 = arith.constant 5.000000e-01 : f32
    %24 = vector.broadcast %cst_9 : f32 to vector<8x256xf32>
    %25 = arith.mulf %24, %23 : vector<8x256xf32>
    %cst_10 = arith.constant 0.707106769 : f32
    %26 = vector.broadcast %cst_10 : f32 to vector<8x256xf32>
    %27 = arith.mulf %23, %26 : vector<8x256xf32>
    %28 = math.erf %27 : vector<8x256xf32>
    %cst_11 = arith.constant 1.000000e+00 : f32
    %29 = vector.broadcast %cst_11 : f32 to vector<8x256xf32>
    %30 = arith.addf %29, %28 : vector<8x256xf32>
    %31 = arith.mulf %25, %30 : vector<8x256xf32>
    %cst_12 = arith.constant 0.000000e+00 : f32
    %32 = vector.broadcast %cst_12 : f32 to vector<8x128xf32>
    %c0_13 = arith.constant 0 : index
    %c0_14 = arith.constant 0 : index
    %33 = vector.load %arg6[%c0_13, %c0_14] : memref<8x512xf32, #tpu.memory_space<vmem>>, vector<8x128xf32>
    tpu.vector_store %arg6[%c0_13, %c0_14], %32 {strides = array<i32>} : memref<8x512xf32, #tpu.memory_space<vmem>>, vector<8x128xf32>,
    %cst_15 = arith.constant 0.000000e+00 : f32
    %34 = vector.broadcast %cst_15 : f32 to vector<8x128xf32>
    %c0_16 = arith.constant 0 : index
    %c384 = arith.constant 384 : index
    %35 = vector.load %arg6[%c0_16, %c384] : memref<8x512xf32, #tpu.memory_space<vmem>>, vector<8x128xf32>
    tpu.vector_store %arg6[%c0_16, %c384], %34 {strides = array<i32>} : memref<8x512xf32, #tpu.memory_space<vmem>>, vector<8x128xf32>,
    %c0_17 = arith.constant 0 : index
    %c128 = arith.constant 128 : index
    %36 = vector.load %arg6[%c0_17, %c128] : memref<8x512xf32, #tpu.memory_space<vmem>>, vector<8x256xf32>
    tpu.vector_store %arg6[%c0_17, %c128], %31 {strides = array<i32>} : memref<8x512xf32, #tpu.memory_space<vmem>>, vector<8x256xf32>,
    %37 = tpu.iota {dimensions = array<i32: 1>} : vector<1x256xi32>
    %c16_i32 = arith.constant 16 : i32
    %c0_i32 = arith.constant 0 : i32
    %38 = arith.cmpi eq, %c16_i32, %c0_i32 : i32
    %c1_i32 = arith.constant 1 : i32
    %39 = arith.select %38, %c1_i32, %c16_i32 : i32
    %40 = vector.broadcast %39 : i32 to vector<1x256xi32>
    %41 = arith.remsi %37, %40 : vector<1x256xi32>
    %c0_i32_18 = arith.constant 0 : i32
    %42 = vector.broadcast %c0_i32_18 : i32 to vector<1x256xi32>
    %43 = arith.cmpi ne, %41, %42 : vector<1x256xi32>
    %c0_i32_19 = arith.constant 0 : i32
    %44 = vector.broadcast %c0_i32_19 : i32 to vector<1x256xi32>
    %45 = arith.cmpi slt, %41, %44 : vector<1x256xi32>
    %c0_i32_20 = arith.constant 0 : i32
    %46 = arith.cmpi slt, %39, %c0_i32_20 : i32
    %47 = vector.broadcast %46 : i1 to vector<1x256xi1>
    %48 = vector.broadcast %47 : vector<1x256xi1> to vector<1x256xi1>
    %49 = arith.xori %45, %48 : vector<1x256xi1>
    %50 = arith.andi %49, %43 : vector<1x256xi1>
    %51 = vector.broadcast %39 : i32 to vector<1x256xi32>
    %52 = arith.addi %41, %51 : vector<1x256xi32>
    %53 = arith.select %50, %52, %41 : vector<1x256xi1>, vector<1x256xi32>
    %c1_i32_21 = arith.constant 1 : i32
    %54 = vector.broadcast %c1_i32_21 : i32 to vector<1x256xi32>
    %55 = arith.cmpi sge, %53, %54 : vector<1x256xi32>
    %56 = arith.extui %55 : vector<1x256xi1> to vector<1x256xi32>
    %57 = arith.sitofp %56 : vector<1x256xi32> to vector<1x256xf32>
    %c14_i32 = arith.constant 14 : i32
    %58 = vector.broadcast %c14_i32 : i32 to vector<1x256xi32>
    %59 = arith.cmpi sle, %53, %58 : vector<1x256xi32>
    %60 = arith.extui %59 : vector<1x256xi1> to vector<1x256xi32>
    %61 = arith.sitofp %60 : vector<1x256xi32> to vector<1x256xf32>
    %c0_22 = arith.constant 0 : index
    %c111 = arith.constant 111 : index
    %62 = vector.load %arg6[%c0_22, %c111] : memref<8x512xf32, #tpu.memory_space<vmem>>, vector<8x256xf32>
    %63 = vector.broadcast %57 : vector<1x256xf32> to vector<8x256xf32>
    %64 = arith.mulf %62, %63 : vector<8x256xf32>
    %65 = vector.extract_strided_slice %64 {offsets = [0, 0], sizes = [4, 256], strides = [1, 1]} : vector<8x256xf32> to vector<4x256xf32>
    %c0_23 = arith.constant 0 : index
    %c0_24 = arith.constant 0 : index
    %66 = vector.load %arg7[%c0_23, %c0_24] : memref<36x512xf32, #tpu.memory_space<vmem>>, vector<4x256xf32>
    tpu.vector_store %arg7[%c0_23, %c0_24], %65 {strides = array<i32>} : memref<36x512xf32, #tpu.memory_space<vmem>>, vector<4x256xf32>,
    %67 = vector.extract_strided_slice %64 {offsets = [4, 0], sizes = [4, 256], strides = [1, 1]} : vector<8x256xf32> to vector<4x256xf32>
    %c0_25 = arith.constant 0 : index
    %c256 = arith.constant 256 : index
    %68 = vector.load %arg7[%c0_25, %c256] : memref<36x512xf32, #tpu.memory_space<vmem>>, vector<4x256xf32>
    tpu.vector_store %arg7[%c0_25, %c256], %67 {strides = array<i32>} : memref<36x512xf32, #tpu.memory_space<vmem>>, vector<4x256xf32>,
    %c0_26 = arith.constant 0 : index
    %c112 = arith.constant 112 : index
    %69 = vector.load %arg6[%c0_26, %c112] : memref<8x512xf32, #tpu.memory_space<vmem>>, vector<8x256xf32>
    %70 = vector.extract_strided_slice %69 {offsets = [0, 0], sizes = [4, 256], strides = [1, 1]} : vector<8x256xf32> to vector<4x256xf32>
    %c4 = arith.constant 4 : index
    %c0_27 = arith.constant 0 : index
    %71 = vector.load %arg7[%c4, %c0_27] : memref<36x512xf32, #tpu.memory_space<vmem>>, vector<4x256xf32>
    tpu.vector_store %arg7[%c4, %c0_27], %70 {strides = array<i32>} : memref<36x512xf32, #tpu.memory_space<vmem>>, vector<4x256xf32>,
    %72 = vector.extract_strided_slice %69 {offsets = [4, 0], sizes = [4, 256], strides = [1, 1]} : vector<8x256xf32> to vector<4x256xf32>
    %c4_28 = arith.constant 4 : index
    %c256_29 = arith.constant 256 : index
    %73 = vector.load %arg7[%c4_28, %c256_29] : memref<36x512xf32, #tpu.memory_space<vmem>>, vector<4x256xf32>
    tpu.vector_store %arg7[%c4_28, %c256_29], %72 {strides = array<i32>} : memref<36x512xf32, #tpu.memory_space<vmem>>, vector<4x256xf32>,
    %c0_30 = arith.constant 0 : index
    %c113 = arith.constant 113 : index
    %74 = vector.load %arg6[%c0_30, %c113] : memref<8x512xf32, #tpu.memory_space<vmem>>, vector<8x256xf32>
    %75 = vector.broadcast %61 : vector<1x256xf32> to vector<8x256xf32>
    %76 = arith.mulf %74, %75 : vector<8x256xf32>
    %77 = vector.extract_strided_slice %76 {offsets = [0, 0], sizes = [4, 256], strides = [1, 1]} : vector<8x256xf32> to vector<4x256xf32>
    %c8 = arith.constant 8 : index
    %c0_31 = arith.constant 0 : index
    %78 = vector.load %arg7[%c8, %c0_31] : memref<36x512xf32, #tpu.memory_space<vmem>>, vector<4x256xf32>
    tpu.vector_store %arg7[%c8, %c0_31], %77 {strides = array<i32>} : memref<36x512xf32, #tpu.memory_space<vmem>>, vector<4x256xf32>,
    %79 = vector.extract_strided_slice %76 {offsets = [4, 0], sizes = [4, 256], strides = [1, 1]} : vector<8x256xf32> to vector<4x256xf32>
    %c8_32 = arith.constant 8 : index
    %c256_33 = arith.constant 256 : index
    %80 = vector.load %arg7[%c8_32, %c256_33] : memref<36x512xf32, #tpu.memory_space<vmem>>, vector<4x256xf32>
    tpu.vector_store %arg7[%c8_32, %c256_33], %79 {strides = array<i32>} : memref<36x512xf32, #tpu.memory_space<vmem>>, vector<4x256xf32>,
    %c0_34 = arith.constant 0 : index
    %c127 = arith.constant 127 : index
    %81 = vector.load %arg6[%c0_34, %c127] : memref<8x512xf32, #tpu.memory_space<vmem>>, vector<8x256xf32>
    %82 = vector.broadcast %57 : vector<1x256xf32> to vector<8x256xf32>
    %83 = arith.mulf %81, %82 : vector<8x256xf32>
    %84 = vector.extract_strided_slice %83 {offsets = [0, 0], sizes = [4, 256], strides = [1, 1]} : vector<8x256xf32> to vector<4x256xf32>
    %c12 = arith.constant 12 : index
    %c0_35 = arith.constant 0 : index
    %85 = vector.load %arg7[%c12, %c0_35] : memref<36x512xf32, #tpu.memory_space<vmem>>, vector<4x256xf32>
    tpu.vector_store %arg7[%c12, %c0_35], %84 {strides = array<i32>} : memref<36x512xf32, #tpu.memory_space<vmem>>, vector<4x256xf32>,
    %86 = vector.extract_strided_slice %83 {offsets = [4, 0], sizes = [4, 256], strides = [1, 1]} : vector<8x256xf32> to vector<4x256xf32>
    %c12_36 = arith.constant 12 : index
    %c256_37 = arith.constant 256 : index
    %87 = vector.load %arg7[%c12_36, %c256_37] : memref<36x512xf32, #tpu.memory_space<vmem>>, vector<4x256xf32>
    tpu.vector_store %arg7[%c12_36, %c256_37], %86 {strides = array<i32>} : memref<36x512xf32, #tpu.memory_space<vmem>>, vector<4x256xf32>,
    %c0_38 = arith.constant 0 : index
    %c128_39 = arith.constant 128 : index
    %88 = vector.load %arg6[%c0_38, %c128_39] : memref<8x512xf32, #tpu.memory_space<vmem>>, vector<8x256xf32>
    %89 = vector.extract_strided_slice %88 {offsets = [0, 0], sizes = [4, 256], strides = [1, 1]} : vector<8x256xf32> to vector<4x256xf32>
    %c16 = arith.constant 16 : index
    %c0_40 = arith.constant 0 : index
    %90 = vector.load %arg7[%c16, %c0_40] : memref<36x512xf32, #tpu.memory_space<vmem>>, vector<4x256xf32>
    tpu.vector_store %arg7[%c16, %c0_40], %89 {strides = array<i32>} : memref<36x512xf32, #tpu.memory_space<vmem>>, vector<4x256xf32>,
    %91 = vector.extract_strided_slice %88 {offsets = [4, 0], sizes = [4, 256], strides = [1, 1]} : vector<8x256xf32> to vector<4x256xf32>
    %c16_41 = arith.constant 16 : index
    %c256_42 = arith.constant 256 : index
    %92 = vector.load %arg7[%c16_41, %c256_42] : memref<36x512xf32, #tpu.memory_space<vmem>>, vector<4x256xf32>
    tpu.vector_store %arg7[%c16_41, %c256_42], %91 {strides = array<i32>} : memref<36x512xf32, #tpu.memory_space<vmem>>, vector<4x256xf32>,
    %c0_43 = arith.constant 0 : index
    %c129 = arith.constant 129 : index
    %93 = vector.load %arg6[%c0_43, %c129] : memref<8x512xf32, #tpu.memory_space<vmem>>, vector<8x256xf32>
    %94 = vector.broadcast %61 : vector<1x256xf32> to vector<8x256xf32>
    %95 = arith.mulf %93, %94 : vector<8x256xf32>
    %96 = vector.extract_strided_slice %95 {offsets = [0, 0], sizes = [4, 256], strides = [1, 1]} : vector<8x256xf32> to vector<4x256xf32>
    %c20 = arith.constant 20 : index
    %c0_44 = arith.constant 0 : index
    %97 = vector.load %arg7[%c20, %c0_44] : memref<36x512xf32, #tpu.memory_space<vmem>>, vector<4x256xf32>
    tpu.vector_store %arg7[%c20, %c0_44], %96 {strides = array<i32>} : memref<36x512xf32, #tpu.memory_space<vmem>>, vector<4x256xf32>,
    %98 = vector.extract_strided_slice %95 {offsets = [4, 0], sizes = [4, 256], strides = [1, 1]} : vector<8x256xf32> to vector<4x256xf32>
    %c20_45 = arith.constant 20 : index
    %c256_46 = arith.constant 256 : index
    %99 = vector.load %arg7[%c20_45, %c256_46] : memref<36x512xf32, #tpu.memory_space<vmem>>, vector<4x256xf32>
    tpu.vector_store %arg7[%c20_45, %c256_46], %98 {strides = array<i32>} : memref<36x512xf32, #tpu.memory_space<vmem>>, vector<4x256xf32>,
    %c0_47 = arith.constant 0 : index
    %c143 = arith.constant 143 : index
    %100 = vector.load %arg6[%c0_47, %c143] : memref<8x512xf32, #tpu.memory_space<vmem>>, vector<8x256xf32>
    %101 = vector.broadcast %57 : vector<1x256xf32> to vector<8x256xf32>
    %102 = arith.mulf %100, %101 : vector<8x256xf32>
    %103 = vector.extract_strided_slice %102 {offsets = [0, 0], sizes = [4, 256], strides = [1, 1]} : vector<8x256xf32> to vector<4x256xf32>
    %c24 = arith.constant 24 : index
    %c0_48 = arith.constant 0 : index
    %104 = vector.load %arg7[%c24, %c0_48] : memref<36x512xf32, #tpu.memory_space<vmem>>, vector<4x256xf32>
    tpu.vector_store %arg7[%c24, %c0_48], %103 {strides = array<i32>} : memref<36x512xf32, #tpu.memory_space<vmem>>, vector<4x256xf32>,
    %105 = vector.extract_strided_slice %102 {offsets = [4, 0], sizes = [4, 256], strides = [1, 1]} : vector<8x256xf32> to vector<4x256xf32>
    %c24_49 = arith.constant 24 : index
    %c256_50 = arith.constant 256 : index
    %106 = vector.load %arg7[%c24_49, %c256_50] : memref<36x512xf32, #tpu.memory_space<vmem>>, vector<4x256xf32>
    tpu.vector_store %arg7[%c24_49, %c256_50], %105 {strides = array<i32>} : memref<36x512xf32, #tpu.memory_space<vmem>>, vector<4x256xf32>,
    %c0_51 = arith.constant 0 : index
    %c144 = arith.constant 144 : index
    %107 = vector.load %arg6[%c0_51, %c144] : memref<8x512xf32, #tpu.memory_space<vmem>>, vector<8x256xf32>
    %108 = vector.extract_strided_slice %107 {offsets = [0, 0], sizes = [4, 256], strides = [1, 1]} : vector<8x256xf32> to vector<4x256xf32>
    %c28 = arith.constant 28 : index
    %c0_52 = arith.constant 0 : index
    %109 = vector.load %arg7[%c28, %c0_52] : memref<36x512xf32, #tpu.memory_space<vmem>>, vector<4x256xf32>
    tpu.vector_store %arg7[%c28, %c0_52], %108 {strides = array<i32>} : memref<36x512xf32, #tpu.memory_space<vmem>>, vector<4x256xf32>,
    %110 = vector.extract_strided_slice %107 {offsets = [4, 0], sizes = [4, 256], strides = [1, 1]} : vector<8x256xf32> to vector<4x256xf32>
    %c28_53 = arith.constant 28 : index
    %c256_54 = arith.constant 256 : index
    %111 = vector.load %arg7[%c28_53, %c256_54] : memref<36x512xf32, #tpu.memory_space<vmem>>, vector<4x256xf32>
    tpu.vector_store %arg7[%c28_53, %c256_54], %110 {strides = array<i32>} : memref<36x512xf32, #tpu.memory_space<vmem>>, vector<4x256xf32>,
    %c0_55 = arith.constant 0 : index
    %c145 = arith.constant 145 : index
    %112 = vector.load %arg6[%c0_55, %c145] : memref<8x512xf32, #tpu.memory_space<vmem>>, vector<8x256xf32>
    %113 = vector.broadcast %61 : vector<1x256xf32> to vector<8x256xf32>
    %114 = arith.mulf %112, %113 : vector<8x256xf32>
    %115 = vector.extract_strided_slice %114 {offsets = [0, 0], sizes = [4, 256], strides = [1, 1]} : vector<8x256xf32> to vector<4x256xf32>
    %c32 = arith.constant 32 : index
    %c0_56 = arith.constant 0 : index
    %116 = vector.load %arg7[%c32, %c0_56] : memref<36x512xf32, #tpu.memory_space<vmem>>, vector<4x256xf32>
    tpu.vector_store %arg7[%c32, %c0_56], %115 {strides = array<i32>} : memref<36x512xf32, #tpu.memory_space<vmem>>, vector<4x256xf32>,
    %117 = vector.extract_strided_slice %114 {offsets = [4, 0], sizes = [4, 256], strides = [1, 1]} : vector<8x256xf32> to vector<4x256xf32>
    %c32_57 = arith.constant 32 : index
    %c256_58 = arith.constant 256 : index
    %118 = vector.load %arg7[%c32_57, %c256_58] : memref<36x512xf32, #tpu.memory_space<vmem>>, vector<4x256xf32>
    tpu.vector_store %arg7[%c32_57, %c256_58], %117 {strides = array<i32>} : memref<36x512xf32, #tpu.memory_space<vmem>>, vector<4x256xf32>,
    %c0_59 = arith.constant 0 : index
    %c0_60 = arith.constant 0 : index
    %119 = vector.load %arg4[%c0_59, %c0_60] : memref<4x36xf32, #tpu.memory_space<vmem>>, vector<4x36xf32>
    %c0_61 = arith.constant 0 : index
    %c0_62 = arith.constant 0 : index
    %120 = vector.load %arg7[%c0_61, %c0_62] : memref<36x512xf32, #tpu.memory_space<vmem>>, vector<36x512xf32>
    %cst_63 = arith.constant dense<0.000000e+00> : vector<4x512xf32>
    %121 = tpu.matmul %119, %120, %cst_63 {dimension_numbers = #tpu.dot_dimension_numbers<[1], [0], [0], [1], [0, 0, 1, 1], [], []>} : vector<4x36xf32>, vector<36x512xf32>, vector<4x512xf32> -> vector<4x512xf32>
    %c0_64 = arith.constant 0 : index
    %c0_65 = arith.constant 0 : index
    %122 = vector.load %arg1[%c0_64, %c0_65] : memref<8x256xf32, #tpu.memory_space<vmem>>, vector<4x256xf32>
    %123 = vector.extract_strided_slice %121 {offsets = [0, 0], sizes = [4, 256], strides = [1, 1]} : vector<4x512xf32> to vector<4x256xf32>
    %124 = arith.addf %122, %123 : vector<4x256xf32>
    %c0_66 = arith.constant 0 : index
    %c0_67 = arith.constant 0 : index
    %125 = vector.load %arg5[%c0_66, %c0_67] : memref<8x256xf32, #tpu.memory_space<vmem>>, vector<4x256xf32>
    tpu.vector_store %arg5[%c0_66, %c0_67], %124 {strides = array<i32>} : memref<8x256xf32, #tpu.memory_space<vmem>>, vector<4x256xf32>,
    %c4_68 = arith.constant 4 : index
    %c0_69 = arith.constant 0 : index
    %126 = vector.load %arg1[%c4_68, %c0_69] : memref<8x256xf32, #tpu.memory_space<vmem>>, vector<4x256xf32>
    %127 = vector.extract_strided_slice %121 {offsets = [0, 256], sizes = [4, 256], strides = [1, 1]} : vector<4x512xf32> to vector<4x256xf32>
    %128 = arith.addf %126, %127 : vector<4x256xf32>
    %c4_70 = arith.constant 4 : index
    %c0_71 = arith.constant 0 : index
    %129 = vector.load %arg5[%c4_70, %c0_71] : memref<8x256xf32, #tpu.memory_space<vmem>>, vector<4x256xf32>
    tpu.vector_store %arg5[%c4_70, %c0_71], %128 {strides = array<i32>} : memref<8x256xf32, #tpu.memory_space<vmem>>, vector<4x256xf32>,
    return
  }
  func.func @transform_0(%arg0: i32) -> (i32, i32) {
    %c0_i32 = arith.constant 0 : i32
    %c0_i32_0 = arith.constant 0 : i32
    return %arg0, %c0_i32 : i32, i32
  }
  func.func @transform_1(%arg0: i32) -> (i32, i32) {
    %c0_i32 = arith.constant 0 : i32
    %c0_i32_0 = arith.constant 0 : i32
    %c0_i32_1 = arith.constant 0 : i32
    return %c0_i32, %c0_i32_0 : i32, i32
  }
  func.func @transform_2(%arg0: i32) -> (i32, i32) {
    %c0_i32 = arith.constant 0 : i32
    %c0_i32_0 = arith.constant 0 : i32
    %c0_i32_1 = arith.constant 0 : i32
    return %c0_i32, %c0_i32_0 : i32, i32
  }
  func.func @transform_3(%arg0: i32) -> (i32, i32) {
    %c0_i32 = arith.constant 0 : i32
    %c0_i32_0 = arith.constant 0 : i32
    %c0_i32_1 = arith.constant 0 : i32
    return %c0_i32, %c0_i32_0 : i32, i32
  }
  func.func @transform_4(%arg0: i32) -> (i32, i32) {
    %c0_i32 = arith.constant 0 : i32
    %c0_i32_0 = arith.constant 0 : i32
    return %arg0, %c0_i32 : i32, i32
  }
}

</mosaic_0001>

<bundles_post_ra>
// kernel: tpu_custom_call.1
= control target key start
LH: loop header
LB: loop body
LE: loop exit
PB: predicated region body
PF: predicated region fallthrough
CT: control target
= control target key end

     0   :  { %v68_v2 = vlaneseq  ;;  %s1020_s0 = inlined_call_operand.vmem [shape: f32[8,256], index: 0, kind: input, shape index: {}]   ;;  %s1021_s1 = inlined_call_operand.vmem [shape: f32[8,1], index: 1, kind: input, shape index: {}]   ;;  %s1022_s2 = inlined_call_operand.vmem [shape: f32[8,1], index: 2, kind: input, shape index: {}]   ;;  %s1023_s3 = inlined_call_operand.vmem [shape: f32[4,36], index: 3, kind: input, shape index: {}]   ;;  %s1024_s4 = inlined_call_operand.hbm [shape: f32[8,256], index: 4, kind: output, shape index: {}]  }
   0x1   :  { %v798_v0 = vld [vmem:[%s1020_s0] sm:$0xff]  ;;  %v803_v1 = vld [vmem:[%s1020_s0 + $0x8] sm:$0xff] }
   0x2   :  { %9 = vsyncpa [#allocation5], 0  ;;  %v20_v3 = vadd.f32 %v803_v1, %v798_v0  ;;  %v25_v4 = vmul.f32 %v798_v0, %v798_v0  ;;  %v26_v5 = vmul.f32 %v803_v1, %v803_v1  ;;  %v759_v6 = vmov 0.0   ;;  %s760_s19 = smov 15   ;;  %s761_s20 = smov 113   ;;  %v35_v44 = vld [vmem:[%s1021_s1] sm:$0xff] }
   0x3   :  { %634 = vmatprep.mubr.f32.mxu1 %v759_v6  ;;  %563 = vmatprep.mubr.f32.mxu0 %v759_v6  ;;  %v69_v7 = vand.u32 127, %v68_v2  ;;  %s762_s21 = smov 1   ;;  %v763_v18 = vmov 0   ;;  %s764_s22 = smov 111   ;;  %vm215_vm4 = vcmask 121856   ;;  %vm198_vm5 = vcmask 924672  }
   0x4   :  { %21 = vadd.xlane.f32.xlu0 %v20_v3  ;;  %v27_v8 = vadd.f32 %v26_v5, %v25_v4  ;;  %719 = vset.pattern.permute.xlu1 %v763_v18  ;;  %s765_s23 = smov 17   ;;  %vm264_vm6 = vcmask 7168   ;;  %s766_s24 = smov 127   ;;  %v37_v48 = vld [vmem:[%s1022_s2] sm:$0xff]  ;;  %v866_v52 = vrot.slane %v759_v6, 4  ;;  %vm133_vm7 = vcmask 138240  }
   0x5   :  { %v70_v9 = vadd.s32 128, %v69_v7  ;;  %v75_v10 = vand.u32 15, %v69_v7  ;;  %730 = vset.pattern.permute.xlu0 %v763_v18  ;;  %s767_s1 = smov 112   ;;  %s768_s2 = smov 16   ;;  %vm244_vm8 = vcmask 1039360   ;;  %vm116_vm9 = vcmask 908288  }
   0x6   :  { %v725_v53 = vpack.i.bf16 %v866_v52, %v759_v6  ;;  %vm398_vm10 = vcmask 916480   ;;  %vm170_vm11 = vcmask 130048   ;;  %vm486_vm12 = vcmask 1043456   ;;  %s769_s12 = smov [#allocation4]  }
   0x7   :  { %v82_v11 = vand.u32 15, %v70_v9  ;;  %vm95_vm0 = vcmp.ge.s32.totalorder %v75_v10, 1  ;;  %vm101_vm2 = vcmp.le.s32.totalorder %v75_v10, 14  ;;  %vm482_vm13 = vcmask 293888   ;;  %s665_s13 = sshll.u32 %s769_s12, 4  ;;  %s666_s13 = int_to_ptr.vmem [resolvable:$true] %s665_s13 }
   0x8   :  { %28 = vadd.xlane.f32.xlu0 %v27_v8  ;;  %v673_v12 = vsel %vm95_vm0, 1.0, %v759_v6  ;;  %v675_v15 = vsel %vm101_vm2, 1.0, %v759_v6  ;;  %s737_s14 = scalar_lea.vmem %s666_s13, 256  ;;  %p742_p1 = scmp.lt.s32.totalorder %s666_s13, %s666_s13 }
   0x9   :  { %vm96_vm1 = vcmp.ge.s32.totalorder %v82_v11, 1  ;;  %vm102_vm3 = vcmp.le.s32.totalorder %v82_v11, 14  ;;  %p738_p0 = scmp.ne.s32.totalorder %s666_s13, %s737_s14  ;;  %p743_p2 = scmp.lt.s32.totalorder %s737_s14, %s737_s14 }
   0xa   :  { %v674_v13 = vsel %vm96_vm1, 1.0, %v759_v6  ;;  %v676_v16 = vsel %vm102_vm3, 1.0, %v759_v6 }
   0xb   :  { %v699_v14 = vpack.i.bf16 %v674_v13, %v673_v12  ;;  %v704_v17 = vpack.i.bf16 %v676_v16, %v675_v15  ;;  %p744_p3 = por %p743_p2, %p742_p1 }
   0xd   :  { %700 = vrot.lane.b32.xlu1 %v699_v14, %s760_s19  ;;  %p745_p4 = pnand %p744_p3, %p738_p0 }
  0x11   :  { %705 = vrot.lane.b32.xlu1 %v704_v17, %s761_s20 }
  0x15   :  { %710 = vrot.lane.b32.xlu1 %v704_v17, %s762_s21 }
  0x19   :  { %715 = vrot.lane.b32.xlu1 %v699_v14, %s764_s22 }
  0x1e   :  { %695 = vrot.lane.b32.xlu0 %v704_v17, %s765_s23 }
  0x7f   :  { %v822_v19 = vpop.permute.xlu1 %700 }
  0x80   :  { %v702_v20 = vunpack.i.l.bf16 %v822_v19  ;;  %v703_v22 = vunpack.i.h.bf16 %v822_v19 }
  0x82   :  { %v831_v25 = vsel %vm215_vm4, %v702_v20, %v703_v22  ;;  %v352_v43 = vmul.f32 0.0, %v703_v22 }
  0x83   :  { %v825_v21 = vpop.permute.xlu1 %705 }
  0x84   :  { %v708_v26 = vunpack.i.h.bf16 %v825_v21  ;;  %v707_v27 = vunpack.i.l.bf16 %v825_v21  ;;  %v370_v51 = vrot.slane %v352_v43, 4 }
  0x86   :  { %v841_v33 = vsel %vm198_vm5, %v707_v27, %v708_v26  ;;  %v203_v54 = vmul.f32 0.0, %v707_v27 }
  0x87   :  { %v835_v29 = vpop.permute.xlu1 %710 }
  0x88   :  { %v712_v32 = vunpack.i.l.bf16 %v835_v29  ;;  %v713_v35 = vunpack.i.h.bf16 %v835_v29  ;;  %v222_v55 = vrot.slane %v203_v54, 4 }
  0x8a   :  { %v850_v39 = vsel %vm264_vm6, %v712_v32, %v713_v35  ;;  %v308_v42 = vmul.f32 0.0, %v713_v35 }
  0x8b   :  { %v876_v56 = vpop.permute.xlu1 %715 }
  0x8c   :  { %v314_v45 = vrot.slane %v308_v42, 4  ;;  %v717_v63 = vunpack.i.l.bf16 %v876_v56  ;;  %v718_v29 = vunpack.i.h.bf16 %v876_v56 }
  0x8d   :  { %v22_v23 = vpop.xlane.xlu0 %21 }
  0x8e   :  { %v24_v24 = vmul.f32 0.00390625, %v22_v23 }
  0x90   :  { %v31_v30 = vmul.f32 %v24_v24, %v24_v24 }
  0x91   :  { %v29_v28 = vpop.xlane.xlu0 %28 }
  0x92   :  { %v30_v31 = vmul.f32 0.00390625, %v29_v28 }
  0x94   :  { %v32_v34 = vsub.f32 %v30_v31, %v31_v30 }
  0x95   :  { %v844_v36 = vpop.permute.xlu0 %695 }
  0x96   :  { %v33_v37 = vadd.f32 1e-05, %v32_v34  ;;  %v698_v38 = vunpack.i.h.bf16 %v844_v36  ;;  %v697_v17 = vunpack.i.l.bf16 %v844_v36 }
  0x98   :  { %731 = vrsqrt.f32 %v33_v37  ;;  %v430_v40 = vmul.f32 0.0, %v698_v38  ;;  %v424_v23 = vsel %vm133_vm7, %v697_v17, %v698_v38  ;;  %v117_v37 = vsel %vm116_vm9, %v717_v63, %v718_v29 }
  0x9a   :  { %v448_v41 = vrot.slane %v430_v40, 4 }
  0x9c   :  { %453 = vrot.lane.b32.xlu0 %v448_v41, %s764_s22 }
  0xa0   :  { %331 = vrot.lane.b32.xlu0 %v308_v42, %s766_s24 }
  0xa4   :  { %360 = vrot.lane.b32.xlu0 %v352_v43, %s761_s20 }
  0xa5   :  { %v732_v46 = vpop.eup %731 }
  0xa6   :  { %v36_v47 = vmul.f32 %v732_v46, %v35_v44 }
  0xa8   :  { %42 = vperm.xlu1 %719, %v36_v47   ;;  %v38_v49 = vmul.f32 %v36_v47, %v24_v24  ;;  %319 = vrot.lane.b32.xlu0 %v314_v45, %s766_s24 }
  0xaa   :  { %v39_v50 = vsub.f32 %v37_v48, %v38_v49 }
  0xac   :  { %49 = vperm.xlu1 %719, %v39_v50  }
  0xb0   :  { %721 = vrot.lane.b32.xlu1 %v699_v14, %s766_s24 }
  0xb4   :  { %375 = vrot.lane.b32.xlu1 %v370_v51, %s761_s20 }
  0xb8   :  { %726 = vrot.lane.b32.xlu1 %v725_v53, %s767_s1 }
  0xbc   :  { %438 = vrot.lane.b32.xlu1 %v430_v40, %s764_s22 }
  0xc0   :  { %225 = vrot.lane.b32.xlu1 %v222_v55, %s760_s19 }
  0xc4   :  { %177 = vrot.lane.b32.xlu1 %v759_v6, %s768_s2  ;;  %v883_v6 = vmul.f32 0.0, %v717_v63 }
 0x10e   :  { %v944_v48 = vpop.permute.xlu0 %453 }
 0x112   :  { %v332_v50 = vpop.permute.xlu0 %331 }
 0x116   :  { %v361_v53 = vpop.permute.xlu0 %360 }
 0x11a   :  { %v948_v55 = vpop.permute.xlu0 %319 }
 0x123   :  { %v43_v57 = vpop.permute.xlu1 %42 }
 0x124   :  { %v45_v58 = vmul.f32 %v43_v57, %v798_v0  ;;  %v46_v59 = vmul.f32 %v43_v57, %v803_v1  ;;  %v140_v1 = vrot.slane %v883_v6, 4 }
 0x127   :  { %v50_v60 = vpop.permute.xlu1 %49 }
 0x128   :  { %v52_v61 = vadd.f32 %v50_v60, %v45_v58  ;;  %v53_v62 = vadd.f32 %v50_v60, %v46_v59 }
 0x12a   :  { %v56_v2 = vmul.f32 0.70710677, %v52_v61  ;;  %v57_v3 = vmul.f32 0.70710677, %v53_v62  ;;  %v54_v10 = vmul.f32 0.5, %v52_v61  ;;  %v55_v12 = vmul.f32 0.5, %v53_v62 }
 0x12b   :  { %v722_v4 = vpop.permute.xlu1 %721 }
 0x12c   :  { %733 = verf.f32 %v56_v2  ;;  %v723_v5 = vunpack.i.l.bf16 %v722_v4  ;;  %v724_v31 = vunpack.i.h.bf16 %v722_v4 }
 0x12d   :  { %735 = verf.f32 %v57_v3 }
 0x12e   :  { %v249_v7 = vmul.f32 0.0, %v723_v5 }
 0x12f   :  { %v946_v49 = vpop.permute.xlu1 %375 }
 0x130   :  { %271 = vrot.lane.b32.xlu0 %v249_v7, %s762_s21  ;;  %v255_v0 = vrot.slane %v249_v7, 4 }
 0x132   :  { %258 = vrot.lane.b32.xlu1 %v255_v0, %s762_s21 }
 0x133   :  { %v727_v51 = vpop.permute.xlu1 %726 }
 0x134   :  { %143 = vrot.lane.b32.xlu0 %v140_v1, %s765_s23 }
 0x138   :  { %209 = vrot.lane.b32.xlu0 %v203_v54, %s760_s19  ;;  %v439_v54 = vpop.permute.xlu1 %438 }
 0x139   :  { %v734_v8 = vpop.eup %733 }
 0x13a   :  { %v736_v9 = vpop.eup %735  ;;  %v60_v11 = vadd.f32 1.0, %v734_v8 }
 0x13b   :  { %v61_v13 = vadd.f32 1.0, %v736_v9 }
 0x13c   :  { %v62_v14 = vmul.f32 %v60_v11, %v54_v10  ;;  %v950_v56 = vpop.permute.xlu1 %225 }
 0x13d   :  { %v63_v15 = vmul.f32 %v61_v13, %v55_v12 }
 0x13e   :  { %285 = vst [vmem:[#allocation3 + $0x8] sm:$0xf] %v62_v14  ;;  %405 = vrot.lane.b32.xlu1 %v62_v14, %s767_s1  ;;  %v162_v16 = vrot.slane %v62_v14, 4  ;;  %v428_v28 = vmul.f32 %v697_v17, %v62_v14  ;;  %v306_v30 = vmul.f32 %v712_v32, %v62_v14  ;;  %v350_v34 = vmul.f32 %v702_v20, %v62_v14 }
 0x13f   :  { %286 = vst [vmem:[#allocation3 + $0x88] sm:$0xf] %v63_v15  ;;  %407 = vrot.lane.b32.xlu0 %v63_v15, %s767_s1  ;;  %v163_v18 = vrot.slane %v63_v15, 4  ;;  %v307_v22 = vmul.f32 %v850_v39, %v63_v15  ;;  %v429_v24 = vmul.f32 %v424_v23, %v63_v15  ;;  %v351_v27 = vmul.f32 %v831_v25, %v63_v15 }
 0x140   :  { %293 = vst [vmem:[#allocation3 + $0x28] sm:$0xf] %v162_v16  ;;  %v245_v25 = vsel %vm244_vm8, %v723_v5, %v724_v31  ;;  %v251_v36 = vmul.f32 %v724_v31, %v63_v15  ;;  %v205_v32 = vmul.f32 %v708_v26, %v63_v15  ;;  %v204_v19 = vmul.f32 %v841_v33, %v62_v14  ;;  %v178_v58 = vpop.permute.xlu1 %177 }
 0x141   :  { %294 = vst [vmem:[#allocation3 + $0x40] sm:$0xf] %v163_v18  ;;  %v250_v35 = vmul.f32 %v245_v25, %v62_v14  ;;  %v123_v20 = vmul.f32 %v718_v29, %v63_v15  ;;  %v122_v38 = vmul.f32 %v117_v37, %v62_v14  ;;  %v447_v21 = vrot.slane %v429_v24, 4 }
 0x142   :  { %181 = vrot.lane.b32.xlu1 %v63_v15, %s768_s2  ;;  %v369_v26 = vrot.slane %v351_v27, 4  ;;  %v446_v33 = vrot.slane %v428_v28, 4  ;;  %v368_v39 = vrot.slane %v350_v34, 4  ;;  %v223_v40 = vrot.slane %v204_v19, 4 }
 0x143   :  { %179 = vrot.lane.b32.xlu0 %v62_v14, %s768_s2  ;;  %v224_v41 = vrot.slane %v205_v32, 4  ;;  %v313_v42 = vrot.slane %v307_v22, 4  ;;  %v141_v43 = vrot.slane %v122_v38, 4  ;;  %v312_v44 = vrot.slane %v306_v30, 4 }
 0x144   :  { %v256_v45 = vrot.slane %v250_v35, 4  ;;  %v142_v46 = vrot.slane %v123_v20, 4  ;;  %v257_v47 = vrot.slane %v251_v36, 4  ;;  %v729_v14 = vunpack.i.h.bf16 %v727_v51 }
 0x146   :  { %329 = vrot.lane.b32.xlu1 %v307_v22, %s766_s24 }
 0x147   :  { %436 = vrot.lane.b32.xlu0 %v429_v24, %s764_s22 }
 0x14a   :  { %358 = vrot.lane.b32.xlu1 %v351_v27, %s761_s20 }
 0x14b   :  { %434 = vrot.lane.b32.xlu0 %v428_v28, %s764_s22 }
 0x14e   :  { %394 = vrot.lane.b32.xlu1 %v163_v18, %s767_s1 }
 0x14f   :  { %327 = vrot.lane.b32.xlu0 %v306_v30, %s766_s24 }
 0x152   :  { %356 = vrot.lane.b32.xlu1 %v350_v34, %s761_s20 }
 0x153   :  { %392 = vrot.lane.b32.xlu0 %v162_v16, %s767_s1 }
 0x156   :  { %273 = vrot.lane.b32.xlu1 %v250_v35, %s762_s21 }
 0x157   :  { %275 = vrot.lane.b32.xlu0 %v251_v36, %s762_s21 }
 0x15a   :  { %213 = vrot.lane.b32.xlu1 %v205_v32, %s760_s19 }
 0x15b   :  { %211 = vrot.lane.b32.xlu0 %v204_v19, %s760_s19 }
 0x15e   :  { %131 = vrot.lane.b32.xlu1 %v123_v20, %s765_s23 }
 0x15f   :  { %129 = vrot.lane.b32.xlu0 %v122_v38, %s765_s23 }
 0x162   :  { %168 = vrot.lane.b32.xlu1 %v163_v18, %s768_s2 }
 0x163   :  { %166 = vrot.lane.b32.xlu0 %v162_v16, %s768_s2 }
 0x166   :  { %451 = vrot.lane.b32.xlu1 %v447_v21, %s764_s22 }
 0x167   :  { %373 = vrot.lane.b32.xlu0 %v369_v26, %s761_s20 }
 0x16a   :  { %449 = vrot.lane.b32.xlu1 %v446_v33, %s764_s22 }
 0x16b   :  { %371 = vrot.lane.b32.xlu0 %v368_v39, %s761_s20 }
 0x16e   :  { %227 = vrot.lane.b32.xlu1 %v223_v40, %s760_s19 }
 0x16f   :  { %229 = vrot.lane.b32.xlu0 %v224_v41, %s760_s19 }
 0x172   :  { %317 = vrot.lane.b32.xlu1 %v313_v42, %s766_s24 }
 0x173   :  { %145 = vrot.lane.b32.xlu0 %v141_v43, %s765_s23 }
 0x176   :  { %315 = vrot.lane.b32.xlu1 %v312_v44, %s766_s24 }
 0x177   :  { %260 = vrot.lane.b32.xlu0 %v256_v45, %s762_s21 }
 0x17a   :  { %147 = vrot.lane.b32.xlu1 %v142_v46, %s765_s23 }
 0x17b   :  { %127 = vrot.lane.b32.xlu0 %v883_v6, %s765_s23 }
 0x17e   :  { %262 = vrot.lane.b32.xlu1 %v257_v47, %s762_s21 }
 0x182   :  { %164 = vrot.lane.b32.xlu1 %v866_v52, %s768_s2  ;;  %v728_v52 = vunpack.i.l.bf16 %v727_v51 }
 0x1a2   :  { %v272_v57 = vpop.permute.xlu0 %271 }
 0x1a4   :  { %v954_v60 = vpop.permute.xlu1 %258 }
 0x1a6   :  { %v952_v59 = vpop.permute.xlu0 %143 }
 0x1aa   :  { %v210_v61 = vpop.permute.xlu0 %209 }
 0x1b0   :  { %v406_v62 = vpop.permute.xlu1 %405 }
 0x1b1   :  { %v408_v63 = vpop.permute.xlu0 %407 }
 0x1b2   :  { %v411_v2 = vsel %vm398_vm10, %v406_v62, %v408_v63  ;;  %v412_v3 = vsel %vm398_vm10, %v408_v63, %v728_v52 }
 0x1b3   :  { %415 = vst [vmem:[#allocation3 + $0x98] sm:$0xf0] %v411_v2  ;;  %416 = vst [vmem:[#allocation3 + $0x60] sm:$0xf0] %v412_v3 }
 0x1b4   :  { %v182_v4 = vpop.permute.xlu1 %181 }
 0x1b5   :  { %v180_v5 = vpop.permute.xlu0 %179 }
 0x1b6   :  { %v183_v6 = vsel %vm170_vm11, %v178_v58, %v180_v5  ;;  %v184_v7 = vsel %vm170_vm11, %v180_v5, %v182_v4 }
 0x1b7   :  { %187 = vst [vmem:[#allocation3 + $0x50] sm:$0xf0] %v183_v6  ;;  %188 = vst [vmem:[#allocation3 + $0x18] sm:$0xf0] %v184_v7 }
 0x1b8   :  { %v330_v0 = vpop.permute.xlu1 %329 }
 0x1b9   :  { %v334_v1 = vsel %vm244_vm8, %v330_v0, %v332_v50  ;;  %v437_v8 = vpop.permute.xlu0 %436 }
 0x1ba   :  { %338 = vst [vmem:[#allocation3 + $0x40] sm:$0xf0] %v334_v1  ;;  %v441_v9 = vsel %vm116_vm9, %v437_v8, %v439_v54 }
 0x1bb   :  { %445 = vst [vmem:[#allocation3 + $0x48] sm:$0xf] %v441_v9 }
 0x1bc   :  { %v359_v10 = vpop.permute.xlu1 %358 }
 0x1bd   :  { %v363_v11 = vsel %vm198_vm5, %v359_v10, %v361_v53  ;;  %v435_v12 = vpop.permute.xlu0 %434 }
 0x1be   :  { %367 = vst [vmem:[#allocation3 + $0x10] sm:$0xf] %v363_v11  ;;  %v440_v13 = vsel %vm116_vm9, %v435_v12, %v437_v8 }
 0x1bf   :  { %444 = vst [vmem:[#allocation3 + $0x20] sm:$0xf] %v440_v13 }
 0x1c0   :  { %v395_v15 = vpop.permute.xlu1 %394 }
 0x1c1   :  { %v400_v16 = vsel %vm398_vm10, %v395_v15, %v729_v14  ;;  %v328_v17 = vpop.permute.xlu0 %327  ;;  %v473_v3 = vld [vmem:[#allocation3 + $0x40] sm:$0xff] }
 0x1c2   :  { %404 = vst [vmem:[#allocation3 + $0x10] sm:$0xf0] %v400_v16  ;;  %v333_v18 = vsel %vm244_vm8, %v328_v17, %v330_v0  ;;  %v479_v22 = vld [vmem:[#allocation3 + $0x48] sm:$0xf]  ;;  %v461_v16 = vld [vmem:[%s1023_s3] sm:$0xf] }
 0x1c3   :  { %337 = vst [vmem:[#allocation3 + $0x28] sm:$0xf0] %v333_v18  ;;  %677 = vmatprep.subr.msk.mxu0 %vm486_vm12, %v479_v22 }
 0x1c4   :  { %v357_v23 = vpop.permute.xlu1 %356 }
 0x1c5   :  { %v362_v24 = vsel %vm198_vm5, %v357_v23, %v359_v10  ;;  %v393_v27 = vpop.permute.xlu0 %392 }
 0x1c6   :  { %366 = vst [vmem:[#allocation3 + $0x58] sm:$0xf] %v362_v24  ;;  %v399_v28 = vsel %vm398_vm10, %v393_v27, %v395_v15  ;;  %v478_v30 = vld [vmem:[#allocation3 + $0x20] sm:$0xf] }
 0x1c7   :  { %403 = vst [vmem:[#allocation3 + $0x58] sm:$0xf0] %v399_v28  ;;  %678 = vmatpush1.msk.msra.mxu0 %vm486_vm12, %v478_v30  ;;  %v647_v28 = vld [vmem:[%s1020_s0] sm:$0xf0] }
 0x1c8   :  { %v274_v31 = vpop.permute.xlu1 %273 }
 0x1c9   :  { %v277_v34 = vsel %vm264_vm6, %v272_v57, %v274_v31  ;;  %v276_v25 = vpop.permute.xlu0 %275  ;;  %v475_v35 = vld [vmem:[#allocation3 + $0x10] sm:$0xff] }
 0x1ca   :  { %281 = vst [vmem:[#allocation3 + $0x78] sm:$0xf0] %v277_v34  ;;  %v278_v36 = vsel %vm264_vm6, %v274_v31, %v276_v25  ;;  %523 = vmatprep.subr.mxu0 %v475_v35  ;;  %v472_v6 = vld [vmem:[#allocation3 + $0x28] sm:$0xff] }
 0x1cb   :  { %282 = vst [vmem:[#allocation3 + $0x80] sm:$0xf0] %v278_v36  ;;  %v648_v34 = vld [vmem:[%s1020_s0 + $0x8] sm:$0xf0] }
 0x1cc   :  { %v214_v29 = vpop.permute.xlu1 %213 }
 0x1cd   :  { %v212_v32 = vpop.permute.xlu0 %211 }
 0x1ce   :  { %v216_v19 = vsel %vm215_vm4, %v210_v61, %v212_v32  ;;  %v217_v20 = vsel %vm215_vm4, %v212_v32, %v214_v29  ;;  %v474_v37 = vld [vmem:[#allocation3 + $0x58] sm:$0xff]  ;;  %v641_v29 = vld [vmem:[%s1020_s0] sm:$0xf] }
 0x1cf   :  { %220 = vst [vmem:[#allocation3 + $0x30] sm:$0xf] %v216_v19  ;;  %221 = vst [vmem:[#allocation3 + $0x68] sm:$0xf] %v217_v20  ;;  %524 = vmatpush1.msra.mxu0 %v474_v37  ;;  %v642_v19 = vld [vmem:[%s1020_s0 + $0x8] sm:$0xf] }
 0x1d0   :  { %v132_v38 = vpop.permute.xlu1 %131 }
 0x1d1   :  { %v130_v21 = vpop.permute.xlu0 %129 }
 0x1d2   :  { %v135_v26 = vsel %vm133_vm7, %v130_v21, %v132_v38 }
 0x1d3   :  { %139 = vst [vmem:[#allocation3 + $0x38] sm:$0xf] %v135_v26 }
 0x1d4   :  { %v169_v33 = vpop.permute.xlu1 %168 }
 0x1d5   :  { %v975_v39 = vpop.permute.xlu0 %166 }
 0x1d6   :  { %v172_v40 = vsel %vm170_vm11, %v975_v39, %v169_v33 }
 0x1d7   :  { %176 = vst [vmem:[#allocation3 + $0x38] sm:$0xf0] %v172_v40 }
 0x1d8   :  { %v452_v41 = vpop.permute.xlu1 %451 }
 0x1d9   :  { %v374_v42 = vpop.permute.xlu0 %373  ;;  %v456_v43 = vsel %vm116_vm9, %v452_v41, %v944_v48 }
 0x1da   :  { %v378_v44 = vsel %vm198_vm5, %v374_v42, %v946_v49  ;;  %460 = vst [vmem:[#allocation3 + $0x90] sm:$0xf] %v456_v43 }
 0x1db   :  { %382 = vst [vmem:[#allocation3 + $0x60] sm:$0xf] %v378_v44 }
 0x1dc   :  { %v450_v45 = vpop.permute.xlu1 %449 }
 0x1dd   :  { %v372_v46 = vpop.permute.xlu0 %371  ;;  %v455_v47 = vsel %vm116_vm9, %v450_v45, %v452_v41 }
 0x1de   :  { %v377_v50 = vsel %vm198_vm5, %v372_v46, %v374_v42  ;;  %459 = vst [vmem:[#allocation3 + $0x70] sm:$0xf] %v455_v47  ;;  %v463_v23 = vld [vmem:[#allocation3 + $0x38] sm:$0xff] }
 0x1df   :  { %381 = vst [vmem:[#allocation3 + $0x98] sm:$0xf] %v377_v50 }
 0x1e0   :  { %v228_v51 = vpop.permute.xlu1 %227 }
 0x1e1   :  { %v230_v53 = vpop.permute.xlu0 %229  ;;  %v231_v54 = vsel %vm215_vm4, %v950_v56, %v228_v51  ;;  %v481_v57 = vld [vmem:[#allocation3 + $0x90] sm:$0xf] }
 0x1e2   :  { %v232_v48 = vsel %vm215_vm4, %v228_v51, %v230_v53  ;;  %235 = vst [vmem:[#allocation3 + $0x78] sm:$0xf] %v231_v54  ;;  %680 = vmatprep.subr.msk.mxu1 %vm486_vm12, %v481_v57  ;;  %v477_v56 = vld [vmem:[#allocation3 + $0x60] sm:$0xff] }
 0x1e3   :  { %236 = vst [vmem:[#allocation3 + $0x80] sm:$0xf] %v232_v48 }
 0x1e4   :  { %v318_v49 = vpop.permute.xlu1 %317 }
 0x1e5   :  { %v146_v58 = vpop.permute.xlu0 %145  ;;  %v322_v61 = vsel %vm244_vm8, %v318_v49, %v948_v55  ;;  %v480_v52 = vld [vmem:[#allocation3 + $0x70] sm:$0xf] }
 0x1e6   :  { %v149_v62 = vsel %vm133_vm7, %v952_v59, %v146_v58  ;;  %326 = vst [vmem:[#allocation3 + $0x88] sm:$0xf0] %v322_v61  ;;  %681 = vmatpush1.msk.msra.mxu1 %vm486_vm12, %v480_v52  ;;  %v476_v63 = vld [vmem:[#allocation3 + $0x98] sm:$0xff] }
 0x1e7   :  { %153 = vst [vmem:[#allocation3 + $0x50] sm:$0xf] %v149_v62  ;;  %594 = vmatprep.subr.mxu1 %v477_v56 }
 0x1e8   :  { %595 = vmatpush1.msra.mxu1 %v476_v63  ;;  %v316_v2 = vpop.permute.xlu1 %315 }
 0x1e9   :  { %v261_v4 = vpop.permute.xlu0 %260  ;;  %v321_v5 = vsel %vm244_vm8, %v316_v2, %v318_v49  ;;  %596 = vmatprep.subr.mxu1 %v473_v3  ;;  %v468_v7 = vld [vmem:[#allocation3 + $0x78] sm:$0xff] }
 0x1ea   :  { %v265_v55 = vsel %vm264_vm6, %v954_v60, %v261_v4  ;;  %325 = vst [vmem:[#allocation3 + $0x8] sm:$0xf0] %v321_v5  ;;  %597 = vmatpush1.msra.mxu1 %v472_v6  ;;  %v469_v59 = vld [vmem:[#allocation3 + $0x80] sm:$0xff] }
 0x1eb   :  { %269 = vst [vmem:[#allocation3 + $0x30] sm:$0xf0] %v265_v55  ;;  %598 = vmatprep.subr.mxu1 %v469_v59 }
 0x1ec   :  { %599 = vmatpush1.msra.mxu1 %v468_v7  ;;  %v148_v0 = vpop.permute.xlu1 %147 }
 0x1ed   :  { %v128_v1 = vpop.permute.xlu0 %127  ;;  %v150_v8 = vsel %vm133_vm7, %v146_v58, %v148_v0  ;;  %v471_v9 = vld [vmem:[#allocation3 + $0x88] sm:$0xff] }
 0x1ee   :  { %v134_v10 = vsel %vm133_vm7, %v128_v1, %v130_v21  ;;  %154 = vst [vmem:[#allocation3 + $0x18] sm:$0xf] %v150_v8  ;;  %525 = vmatprep.subr.mxu0 %v471_v9  ;;  %v464_v17 = vld [vmem:[#allocation3 + $0x50] sm:$0xff] }
 0x1ef   :  { %138 = vst [vmem:[#allocation3] sm:$0xf] %v134_v10 }
 0x1f0   :  { %v263_v11 = vpop.permute.xlu1 %262 }
 0x1f1   :  { %v266_v60 = vsel %vm264_vm6, %v261_v4, %v263_v11  ;;  %v470_v12 = vld [vmem:[#allocation3 + $0x8] sm:$0xff] }
 0x1f2   :  { %270 = vst [vmem:[#allocation3 + $0x68] sm:$0xf0] %v266_v60  ;;  %526 = vmatpush1.msra.mxu0 %v470_v12  ;;  %v466_v22 = vld [vmem:[#allocation3 + $0x30] sm:$0xff] }
 0x1f4   :  { %v165_v13 = vpop.permute.xlu1 %164 }
 0x1f5   :  { %v171_v14 = vsel %vm170_vm11, %v165_v13, %v975_v39  ;;  %v465_v15 = vld [vmem:[#allocation3 + $0x18] sm:$0xff] }
 0x1f6   :  { %175 = vst [vmem:[#allocation3] sm:$0xf0] %v171_v14  ;;  %600 = vmatprep.subr.mxu1 %v465_v15 }
 0x1f7   :  { %601 = vmatpush1.msra.mxu1 %v464_v17 }
 0x1f8   :  { %682 = vmatmul.mubr.msk.f32.vlgmr.msra.gmra.mxu1 %vm482_vm13, %v461_v16 }
 0x1f9   :  { %v467_v18 = vld [vmem:[#allocation3 + $0x68] sm:$0xff] }
 0x1fa   :  { %527 = vmatprep.subr.mxu0 %v467_v18 }
 0x1fb   :  { %528 = vmatpush1.msra.mxu0 %v466_v22 }
 0x1fc   :  { %529 = vmatprep.subr.mxu0 %v463_v23 }
 0x1fd   :  { %v462_v24 = vld [vmem:[#allocation3] sm:$0xff] }
 0x1fe   :  { %530 = vmatpush1.msra.mxu0 %v462_v24 }
 0x1ff   :  { %679 = vmatmul.mubr.msk.f32.vlgmr.msra.gmra.mxu0 %vm482_vm13, %v461_v16 }
 0x2b8   :  { %v636_v27 = vpop.f32.mrf.mxu1 }
 0x2b9   :  { %v651_v30 = vrot.slane %v636_v27, 4 }
 0x2ba   :  { %v638_v31 = vpop.f32.mrf.mxu1 }
 0x2bb   :  { %v655_v25 = vadd.f32 %v651_v30, %v647_v28  ;;  %v652_v35 = vrot.slane %v638_v31, 4 }
 0x2bd   :  { %657 = vst [vmem:[#allocation4] sm:$0xf0] %v655_v25  ;;  %v656_v36 = vadd.f32 %v652_v35, %v648_v34 }
 0x2bf   :  { %658 = vst [vmem:[#allocation4 + $0x8] sm:$0xf0] %v656_v36  ;;  %v565_v32 = vpop.f32.mrf.mxu0 }
 0x2c0   :  { %v643_v20 = vadd.f32 %v641_v29, %v565_v32 }
 0x2c1   :  { %v567_v37 = vpop.f32.mrf.mxu0 }
 0x2c2   :  { %645 = vst [vmem:[#allocation4] sm:$0xf] %v643_v20  ;;  %v644_v38 = vadd.f32 %v642_v19, %v567_v37 }
 0x2c4   :  { %646 = vst [vmem:[#allocation4 + $0x8] sm:$0xf] %v644_v38 }
 0x2c5   :  { %748 = shalt.err (!%p745_p4)
}
 0x2c6   :  { %668 = dma.vmem_to_hbm [thread:$0]  %s666_s13, 256, %s1024_s4, [#allocation5]  }
 0x2c7   :  { %757 = dma.done.wait [#allocation5], 256  }
 0x2c8   :  { %758 = vsyncadd [#allocation5], 4294967040 }
 0x2c9   :  { %672 = vsyncpa [#allocation5], 1 }

</bundles_post_ra>
